<compile_context>
chip_gen: v5e
topology: v5e:2x2
jax: 0.10.0
libtpu: 0.0.40
codegen_flags: <defaults>
</compile_context>

<pallas_src>
import functools
import math

import jax
import jax.numpy as jnp
from jax import lax
from jax.experimental import pallas as pl
from jax.experimental.pallas import tpu as pltpu


def _round_up(x, m):
    return -(-x // m) * m


def _min_sublane(dtype):
    # Minimum second-to-last tile dim by dtype width.
    return {4: 8, 2: 16, 1: 32}.get(jnp.dtype(dtype).itemsize, 8)


# ----------------------------- kernels --------------------------------------

def _bell2_kernel_const(x_ref, o_ref, *, c_eff, inv_a, int_b, b_val):
    """Static a/b/c/c2: parameters folded into immediates (no SMEM operand)."""
    x = x_ref[...].astype(jnp.float32)
    u = (x - c_eff) * inv_a                 # (x - c_eff) / a
    dist = u * u                            # ((x - c_eff) / a) ** 2
    if int_b is not None:
        # Integer exponent: dist**b is pure VPU multiplies; the divide goes
        # to the EUP so the VALU stays nearly idle (kernel stays HBM-bound
        # even at v7x bandwidth).
        p = lax.integer_pow(dist, int_b)
        out = pl.reciprocal(1.0 + p, approx=False)
    else:
        # General float b:
        #   1/(1 + dist**b) = 1/(1 + exp(2*b*log|u|)) = 0.5*(1 - tanh(b*log|u|))
        # -> 2 EUP ops (log + tanh).  At u == 0: log -> -inf, tanh -> -1,
        # out -> 1.0, matching torch.  (Far tail saturates to exactly 0 vs
        # torch's ~1e-8; well inside tolerance.)
        out = 0.5 * (1.0 - jnp.tanh(b_val * jnp.log(jnp.abs(u))))
    o_ref[...] = out.astype(o_ref.dtype)


def _bell2_kernel_smem(params_ref, x_ref, o_ref):
    """Traced/learned parameters: params_ref (SMEM) = [c_eff, 1/a, b]."""
    c_eff = params_ref[0]
    inv_a = params_ref[1]
    b = params_ref[2]
    x = x_ref[...].astype(jnp.float32)
    u = (x - c_eff) * inv_a
    out = 0.5 * (1.0 - jnp.tanh(b * jnp.log(jnp.abs(u))))
    o_ref[...] = out.astype(o_ref.dtype)


# ----------------------------- wrapper ---------------------------------------

def bell_memb_func2(x, a, b, c, c2, *, right_side=False,
                    lane_cols=2048, target_block_bytes=8 * 1024 * 1024):
    """JAX/Pallas equivalent of BellMembFunc2.forward (elementwise)."""
    orig_shape = x.shape
    orig_dtype = x.dtype
    total = max(1, math.prod(orig_shape))
    itemsize = jnp.dtype(orig_dtype).itemsize
    sub = _min_sublane(orig_dtype)

    # Lane-dense 2D slab: (rows, cols), cols a multiple of 128.  Each
    # (tr, cols) block is a contiguous HBM region (one DMA descriptor).
    cols = min(int(lane_cols), _round_up(total, 128))
    rows = -(-total // cols)

    # Row tile: ~target_block_bytes per block, dtype-aware sublane alignment,
    # and at least 2 grid programs when possible so both v7x TCs get work.
    max_tr = max(sub, (target_block_bytes // (cols * itemsize)) // sub * sub)
    grid_n = -(-rows // max_tr)
    if grid_n <= 1:
        grid_n = 2 if rows >= 2 * sub else 1
    if grid_n == 1:
        tr = rows                           # full-dim block (any size is legal)
    else:
        tr = _round_up(-(-rows // grid_n), sub)
    padded_rows = grid_n * tr
    padded_total = padded_rows * cols

    flat = x.reshape(-1)
    if padded_total != total:               # only pad when actually needed
        flat = jnp.pad(flat, (0, padded_total - total))
    x2 = flat.reshape(padded_rows, cols)
    grid = (grid_n,)

    x_spec = pl.BlockSpec((tr, cols), lambda i: (i, 0))
    out_spec = pl.BlockSpec((tr, cols), lambda i: (i, 0))
    out_shape = jax.ShapeDtypeStruct((padded_rows, cols), orig_dtype)
    compiler_params = pltpu.CompilerParams(
        dimension_semantics=("parallel",),
        # ~32 MiB pipelined footprint at default 8 MiB blocks; 48 MiB scoped
        # limit leaves headroom and fits v7x's 64 MiB physical VMEM (and is
        # above v5e's 16 MiB default, which would otherwise force tiny tiles).
        vmem_limit_bytes=48 * 1024 * 1024,
    )

    params_static = all(
        isinstance(p, (int, float)) and not isinstance(p, bool)
        for p in (a, b, c, c2)
    )

    if params_static:
        # Fold everything into immediates; no SMEM operand at all.
        c_eff = float(c) + float(c2) if right_side else float(c) - float(c2)
        inv_a = 1.0 / float(a)
        bf = float(b)
        int_b = int(round(bf)) if (bf == round(bf) and 1 <= round(bf) <= 32) else None
        kernel = functools.partial(_bell2_kernel_const, c_eff=c_eff,
                                   inv_a=inv_a, int_b=int_b, b_val=bf)
        out2 = pl.pallas_call(
            kernel,
            out_shape=out_shape,
            grid=grid,
            in_specs=[x_spec],
            out_specs=out_spec,
            compiler_params=compiler_params,
        )(x2)
    else:
        # Traced / learned parameters -> fold c_eff and 1/a on the host,
        # ship [c_eff, 1/a, b] as SMEM scalars.
        c_eff = c + c2 if right_side else c - c2
        params = jnp.stack([
            jnp.asarray(c_eff, jnp.float32),
            jnp.asarray(1.0 / a, jnp.float32),
            jnp.asarray(b, jnp.float32),
        ])
        out2 = pl.pallas_call(
            _bell2_kernel_smem,
            out_shape=out_shape,
            grid=grid,
            in_specs=[pl.BlockSpec(memory_space=pltpu.MemorySpace.SMEM), x_spec],
            out_specs=out_spec,
            compiler_params=compiler_params,
        )(params, x2)

    out_flat = out2.reshape(-1)
    if padded_total != total:
        out_flat = out_flat[:total]
    return out_flat.reshape(orig_shape)


def bell_memb_func2_ref(x, a, b, c, c2, *, right_side=False):
    """Pure-JAX reference mirroring the PyTorch forward."""
    a = jnp.asarray(a, jnp.float32)
    b = jnp.asarray(b, jnp.float32)
    c = jnp.asarray(c, jnp.float32)
    c2 = jnp.asarray(c2, jnp.float32)
    c_eff = c + c2 if right_side else c - c2
    xf = x.astype(jnp.float32)
    dist = jnp.square((xf - c_eff) / a)
    return (1.0 / (1.0 + jnp.power(dist, b))).astype(x.dtype)


if __name__ == "__main__":
    key = jax.random.PRNGKey(0)
    k1, k2, k3 = jax.random.split(key, 3)

    a, b, c, c2 = 1.5, 2.0, 0.25, 0.75

    # 1) Module-default config: static params, integer b -> immediates + int path.
    x = jax.random.normal(k1, (2, 4, 16, 16), dtype=jnp.float32)
    out = jax.block_until_ready(bell_memb_func2(x, a, b, c, c2, right_side=False))
    ref = bell_memb_func2_ref(x, a, b, c, c2, right_side=False)
    assert out.shape == x.shape and out.dtype == x.dtype
    assert jnp.allclose(out, ref, atol=1e-5, rtol=1e-5)

    # 2) Static non-integer b + right_side branch (tanh/log path).
    out2 = jax.block_until_ready(bell_memb_func2(x, a, 2.5, c, c2, right_side=True))
    ref2 = bell_memb_func2_ref(x, a, 2.5, c, c2, right_side=True)
    assert jnp.allclose(out2, ref2, atol=1e-5, rtol=1e-5)

    # 3) Larger shape -> multi-program grid (shards across both v7x TCs).
    x3 = jax.random.normal(k2, (4, 8, 32, 128), dtype=jnp.float32)
    out3 = jax.block_until_ready(bell_memb_func2(x3, a, b, c, c2))
    ref3 = bell_memb_func2_ref(x3, a, b, c, c2)
    assert out3.shape == x3.shape
    assert jnp.allclose(out3, ref3, atol=1e-5, rtol=1e-5)

    # 4) bf16 I/O (halves HBM bytes; compute stays f32).
    xb = x.astype(jnp.bfloat16)
    outb = jax.block_until_ready(bell_memb_func2(xb, a, b, c, c2))
    refb = bell_memb_func2_ref(xb, a, b, c, c2)
    assert outb.dtype == jnp.bfloat16
    assert jnp.allclose(outb.astype(jnp.float32), refb.astype(jnp.float32),
                        atol=2e-2, rtol=2e-2)

    # 5) Traced / learned parameters -> SMEM path.
    aj = jnp.asarray(1.5, jnp.float32)
    bj = jnp.asarray(2.0, jnp.float32)
    cj = jnp.asarray(0.25, jnp.float32)
    c2j = jnp.asarray(0.75, jnp.float32)
    out5 = jax.block_until_ready(bell_memb_func2(x, aj, bj, cj, c2j))
    ref5 = bell_memb_func2_ref(x, 1.5, 2.0, 0.25, 0.75)
    assert jnp.allclose(out5, ref5, atol=1e-5, rtol=1e-5)

    # 6) Awkward shape whose flat size is not (8,128)-friendly -> padded tail.
    x6 = jax.random.normal(k3, (3, 5, 7, 11), dtype=jnp.float32)
    out6 = jax.block_until_ready(bell_memb_func2(x6, a, b, c, c2))
    ref6 = bell_memb_func2_ref(x6, a, b, c, c2)
    assert out6.shape == x6.shape
    assert jnp.allclose(out6, ref6, atol=1e-5, rtol=1e-5)

    # TODO(synk): BellMembFunc.b_log_hook is a backward-pass gradient hook
    # (NaN scrubbing on b's grad) and has no forward-pass Pallas equivalent.
    print("KERNEL_OK")
</pallas_src>

<mosaic_0001>
module attributes {stable_mosaic.version = 11 : i64} {
  func.func @_bell2_kernel_const(%arg0: i32, %arg1: memref<1x2048xf32, #tpu.memory_space<vmem>>, %arg2: memref<1x2048xf32, #tpu.memory_space<vmem>>) attributes {dimension_semantics = [#tpu.dimension_semantics<parallel>], iteration_bounds = array<i64: 1>, scalar_prefetch = 0 : i64, scratch_operands = 0 : i64, tpu.core_type = #tpu.core_type<tc>, window_params = [{transform_indices = @transform_0, window_bounds = array<i64: 1, 2048>}, {transform_indices = @transform_1, window_bounds = array<i64: 1, 2048>}]} {
    %c0 = arith.constant 0 : index
    %c0_0 = arith.constant 0 : index
    %0 = vector.load %arg1[%c0, %c0_0] : memref<1x2048xf32, #tpu.memory_space<vmem>>, vector<1x2048xf32>
    %cst = arith.constant -5.000000e-01 : f32
    %1 = vector.broadcast %cst : f32 to vector<1x2048xf32>
    %2 = arith.subf %0, %1 : vector<1x2048xf32>
    %cst_1 = arith.constant 0.666666686 : f32
    %3 = vector.broadcast %cst_1 : f32 to vector<1x2048xf32>
    %4 = arith.mulf %2, %3 : vector<1x2048xf32>
    %5 = arith.mulf %4, %4 : vector<1x2048xf32>
    %6 = arith.mulf %5, %5 : vector<1x2048xf32>
    %cst_2 = arith.constant 1.000000e+00 : f32
    %7 = vector.broadcast %cst_2 : f32 to vector<1x2048xf32>
    %8 = arith.addf %7, %6 : vector<1x2048xf32>
    %9 = tpu.reciprocal %8 : vector<1x2048xf32> -> vector<1x2048xf32>
    %c0_3 = arith.constant 0 : index
    %c0_4 = arith.constant 0 : index
    %10 = vector.load %arg2[%c0_3, %c0_4] : memref<1x2048xf32, #tpu.memory_space<vmem>>, vector<1x2048xf32>
    tpu.vector_store %arg2[%c0_3, %c0_4], %9 {strides = array<i32>} : memref<1x2048xf32, #tpu.memory_space<vmem>>, vector<1x2048xf32>,
    return
  }
  func.func @transform_0(%arg0: i32) -> (i32, i32) {
    %c0_i32 = arith.constant 0 : i32
    %c0_i32_0 = arith.constant 0 : i32
    return %arg0, %c0_i32 : i32, i32
  }
  func.func @transform_1(%arg0: i32) -> (i32, i32) {
    %c0_i32 = arith.constant 0 : i32
    %c0_i32_0 = arith.constant 0 : i32
    return %arg0, %c0_i32 : i32, i32
  }
}

</mosaic_0001>

<bundles_post_ra>
// kernel: tpu_custom_call.1
= control target key start
LH: loop header
LB: loop body
LE: loop exit
PB: predicated region body
PF: predicated region fallthrough
CT: control target
= control target key end

     0   :  { %6 = vsyncpa [#allocation3], 0  ;;  %s160_s0 = inlined_call_operand.hbm [shape: f32[1,2048], index: 0, kind: input, shape index: {}]   ;;  %s161_s1 = inlined_call_operand.hbm [shape: f32[1,2048], index: 1, kind: output, shape index: {}]  }
   0x1   :  { %7 = vsyncpa [#allocation4], 0  ;;  %s13_s8 = sshll.u32 %s160_s0, 4  ;;  %s142_s9 = smov [#allocation2]   ;;  %s14_s8 = int_to_ptr.hbm [resolvable:$true] %s13_s8 }
   0x2   :  { %s15_s10 = sshll.u32 %s142_s9, 4  ;;  %s16_s10 = int_to_ptr.vmem [resolvable:$true] %s15_s10 }
   0x3   :  { %18 = dma.hbm_to_vmem [thread:$0]  %s14_s8, 256, %s16_s10, [#allocation3]  }
   0x4   :  { %138 = dma.done.wait [#allocation3], 256  }
   0x5   :  { %139 = vsyncadd [#allocation3], 4294967040  ;;  %v23_v0 = vld [vmem:[#allocation2] sm:$0xff]  ;;  %v24_v1 = vld [vmem:[#allocation2 + $0x8] sm:$0xff]  ;;  %s143_s0 = smov [#allocation5]   ;;  %s72_s14 = sshll.u32 %s161_s1, 4  ;;  %s73_s14 = int_to_ptr.hbm [resolvable:$true] %s72_s14 }
   0x6   :  { %v82_v2 = vadd.f32 0.5, %v23_v0  ;;  %v83_v3 = vadd.f32 0.5, %v24_v1  ;;  %s70_s11 = sshll.u32 %s143_s0, 4  ;;  %s71_s11 = int_to_ptr.vmem [resolvable:$true] %s70_s11 }
   0x8   :  { %v27_v4 = vmul.f32 0.6666667, %v82_v2  ;;  %v28_v5 = vmul.f32 0.6666667, %v83_v3 }
   0xa   :  { %v29_v6 = vmul.f32 %v27_v4, %v27_v4  ;;  %v30_v7 = vmul.f32 %v28_v5, %v28_v5 }
   0xc   :  { %v31_v8 = vmul.f32 %v29_v6, %v29_v6  ;;  %v32_v9 = vmul.f32 %v30_v7, %v30_v7 }
   0xe   :  { %v33_v10 = vadd.f32 1.0, %v31_v8  ;;  %v34_v11 = vadd.f32 1.0, %v32_v9 }
  0x10   :  { %86 = vrcp.f32 %v33_v10  ;;  %vm40_vm0 = vweird.f32 %v33_v10  ;;  %v46_v15 = vand.u32 2147483648, %v33_v10  ;;  %v44_v18 = vand.u32 2147483647, %v33_v10 }
  0x11   :  { %88 = vrcp.f32 %v34_v11  ;;  %v60_v19 = vand.u32 2147483648, %v34_v11  ;;  %vm54_vm2 = vweird.f32 %v34_v11  ;;  %v58_v21 = vand.u32 2147483647, %v34_v11 }
  0x12   :  { %v47_v23 = vor.u32 1.1754944e-38, %v46_v15  ;;  %vm45_vm5 = vcmp.eq.f32.partialorder %v44_v18, 8.507059e+37 }
  0x13   :  { %v61_v26 = vor.u32 1.1754944e-38, %v60_v19  ;;  %vm59_vm7 = vcmp.eq.f32.partialorder %v58_v21, 8.507059e+37 }
  0x16   :  { %v87_v12 = vpop.eup %86 }
  0x17   :  { %v89_v13 = vpop.eup %88  ;;  %v36_v14 = vmul.f32 %v87_v12, %v33_v10  ;;  %vm41_vm1 = vweird.f32 %v87_v12 }
  0x18   :  { %v50_v16 = vmul.f32 %v89_v13, %v34_v11  ;;  %vm55_vm3 = vweird.f32 %v89_v13  ;;  %vm42_vm4 = vmor %vm40_vm0, %vm41_vm1 }
  0x19   :  { %v37_v17 = vsub.f32 1.0, %v36_v14  ;;  %vm56_vm6 = vmor %vm54_vm2, %vm55_vm3 }
  0x1a   :  { %v51_v20 = vsub.f32 1.0, %v50_v16 }
  0x1b   :  { %v38_v22 = vmul.f32 %v87_v12, %v37_v17 }
  0x1c   :  { %v52_v24 = vmul.f32 %v89_v13, %v51_v20 }
  0x1d   :  { %v39_v25 = vadd.f32 %v87_v12, %v38_v22 }
  0x1e   :  { %v53_v27 = vadd.f32 %v89_v13, %v52_v24 }
  0x1f   :  { %v43_v28 = vsel %vm42_vm4, %v87_v12, %v39_v25 }
  0x20   :  { %v48_v29 = vsel %vm45_vm5, %v47_v23, %v43_v28  ;;  %v57_v30 = vsel %vm56_vm6, %v89_v13, %v53_v27 }
  0x21   :  { %63 = vst [vmem:[#allocation5] sm:$0xff] %v48_v29  ;;  %v62_v31 = vsel %vm59_vm7, %v61_v26, %v57_v30 }
  0x22   :  { %64 = vst [vmem:[#allocation5 + $0x8] sm:$0xff] %v62_v31 }
  0x23   :  { %75 = dma.vmem_to_hbm [thread:$0]  %s71_s11, 256, %s73_s14, [#allocation4]  }
  0x24   :  { %140 = dma.done.wait [#allocation4], 256  }
  0x25   :  { %141 = vsyncadd [#allocation4], 4294967040 }
  0x26   :  { %80 = vsyncpa [#allocation3], 1 }
  0x27   :  { %81 = vsyncpa [#allocation4], 1 }

</bundles_post_ra>
